<compile_context>
chip_gen: v5e
topology: v5e:2x2
jax: 0.10.0
libtpu: 0.0.40
codegen_flags: <defaults>
</compile_context>

<pallas_src>
import functools
import math

import jax
import jax.numpy as jnp
from jax.experimental import pallas as pl
from jax.experimental.pallas import tpu as pltpu


# ---------------------------------------------------------------------------
# Elementwise activation: value + 1st/2nd derivative from ONE shared
# transcendental evaluation (mirrors ActivationFunc, Sigmoid, Tanh, LeakyReLU,
# Sinusoidal from the PyTorch module).
# Returns (y, g1, g2); g1/g2 are None when not requested by `mode`.
# ---------------------------------------------------------------------------
def _act_apply(name, x, mode):
    if name == "none":
        g1 = jnp.ones_like(x) if mode >= 1 else None
        g2 = jnp.zeros_like(x) if mode >= 2 else None
        return x, g1, g2
    if name == "sigmoid":
        s = jax.nn.sigmoid(x)                       # single EUP evaluation
        g1 = s * (1.0 - s) if mode >= 1 else None
        g2 = (1.0 - 2.0 * s) * g1 if mode >= 2 else None
        return s, g1, g2
    if name == "tanh":
        t = jnp.tanh(x)                             # single EUP evaluation
        g1 = 1.0 - t * t if mode >= 1 else None
        g2 = -2.0 * t * g1 if mode >= 2 else None
        return t, g1, g2
    if name in ("relu", "leaky_relu", "lrelu"):
        slope = 0.0 if name == "relu" else 0.01
        pos = x >= 0
        y = jnp.where(pos, x, slope * x)
        g1 = jnp.where(pos, jnp.ones_like(x), jnp.full_like(x, slope)) if mode >= 1 else None
        # NOTE: 2nd derivative hard-coded to 0 (delta term dropped), matching
        # the PyTorch LeakyReLU.grad(ord=2) convention.
        g2 = jnp.zeros_like(x) if mode >= 2 else None
        return y, g1, g2
    if name in ("sin", "siren"):
        s = jnp.sin(x)
        g1 = jnp.cos(x) if mode >= 1 else None
        g2 = -s if mode >= 2 else None              # reuse sin; no 3rd EUP op
        return s, g1, g2
    raise ValueError(f"unknown activation {name!r}")


def _ceil_to(x, m):
    return ((x + m - 1) // m) * m


# ---------------------------------------------------------------------------
# One-time parameter preparation (outside the hot path):
#   torch-style (W (out,in), b (out,))  ->  (W^T zero-padded to (Kpad, out) in
#   the MXU dtype, bias as (1, out) f32).  Kpad is a multiple of 128 so the
#   matmul LHS (the VMEM scratch slab) stays lane-dense.
# ---------------------------------------------------------------------------
def prepare_params(params, mxu_dtype=jnp.bfloat16):
    dins = [jnp.asarray(w).shape[1] for w, _ in params]
    kpad = _ceil_to(max(dins), 128)
    prepped = []
    for w, b in params:
        w = jnp.asarray(w, jnp.float32)
        dout, din = w.shape
        wt = (jnp.zeros((kpad, dout), jnp.float32)
              .at[:din, :].set(w.T)
              .astype(mxu_dtype))
        prepped.append((wt, jnp.asarray(b, jnp.float32).reshape(1, -1)))
    return prepped


# ---------------------------------------------------------------------------
# Fused kernel: the whole MLP for one batch tile.
#
# Scratch slab `z_sc` row layout (all rows share the feature/lane axis, lane
# width Kpad, unused columns zero so the zero-padded K rows of W^T see finite
# data):
#   rows [0, tb)                     : x
#   rows [tb, tb + tb*nh)            : dx   (group j = rows [tb + j*tb, ...))
#   rows [tb + tb*nh, tb*(1+2*nh))   : d2x  (same j-major ordering)
# ---------------------------------------------------------------------------
def _fused_mlp_kernel(*refs, acts, tb, nh, mode):
    n_layers = len(acts)
    n_in = 1 + (1 if mode >= 1 else 0) + (1 if mode >= 2 else 0)
    in_refs = refs[:n_in]
    w_refs = refs[n_in:n_in + 2 * n_layers]
    out_refs = refs[n_in + 2 * n_layers:-1]
    z_sc = refs[-1]                                   # (rows, Kpad) f32

    din0 = in_refs[0].shape[-1]

    # Stage this tile's x / dx / d2x rows into the persistent scratch slab.
    z_sc[...] = jnp.zeros(z_sc.shape, z_sc.dtype)     # clears lane padding
    z_sc[:tb, :din0] = in_refs[0][...]
    if mode >= 1:
        z_sc[tb:tb + nh * tb, :din0] = in_refs[1][...].reshape(nh * tb, din0)
    if mode >= 2:
        z_sc[tb + nh * tb:, :din0] = in_refs[2][...].reshape(nh * tb, din0)

    for l, act in enumerate(acts):
        wt = w_refs[2 * l][...]                       # (Kpad, dout_l), bf16
        b = w_refs[2 * l + 1][...]                    # (1, dout_l), f32
        dout = wt.shape[1]
        last = l == n_layers - 1

        # ONE MXU matmul shared by the x / dx / d2x rows (bf16 in, f32 accum).
        zl = jnp.dot(z_sc[...].astype(wt.dtype), wt,
                     preferred_element_type=jnp.float32)      # (rows, dout)

        if mode == 0:
            y, _, _ = _act_apply(act, zl + b, 0)
            if last:
                out_refs[0][...] = y.astype(out_refs[0].dtype)
            else:
                z_sc[:, :dout] = y
            continue

        # Leading-axis view (tb is a multiple of 8: sublane-aligned, no copy).
        zg = zl.reshape(1 + mode * nh, tb, dout)
        yl = zg[0] + b                                 # bias only on x rows
        y, g1, g2 = _act_apply(act, yl, mode)          # shared transcendental
        dyl = zg[1:1 + nh]                             # (nh, tb, dout)
        dy = g1[None] * dyl                            # broadcast, no concat
        if mode >= 2:
            d2yl = zg[1 + nh:]
            d2y = g2[None] * (dyl * dyl) + g1[None] * d2yl

        if last:
            out_refs[0][...] = y.astype(out_refs[0].dtype)
            out_refs[1][...] = dy.astype(out_refs[1].dtype)
            if mode >= 2:
                out_refs[2][...] = d2y.astype(out_refs[2].dtype)
        else:
            # Write next-layer LHS rows in place (no slab re-concatenation).
            z_sc[:tb, :dout] = y
            z_sc[tb:tb + nh * tb, :dout] = dy.reshape(nh * tb, dout)
            if mode >= 2:
                z_sc[tb + nh * tb:, :dout] = d2y.reshape(nh * tb, dout)


# ---------------------------------------------------------------------------
# MLP.forward equivalent (shapes follow the PyTorch module):
#   x (B, in_dim), dx_dh (B, in_dim, nh), d2x_dh2 (B, in_dim, nh)
# Returns (y, dy_dh, d2y_dh2) with dy/d2y of shape (B, out_dim, nh).
# ---------------------------------------------------------------------------
def mlp_forward(prepared_params, activations, x, dx_dh=None, d2x_dh2=None,
                row_target=512, vmem_budget_bytes=40 * 1024 * 1024):
    assert len(prepared_params) == len(activations) >= 1
    B, din0 = x.shape
    mode = 0 if dx_dh is None else (1 if d2x_dh2 is None else 2)
    nh = int(dx_dh.shape[-1]) if mode else 0

    kpad = prepared_params[0][0].shape[0]
    douts = [wt.shape[1] for wt, _ in prepared_params]
    dout_last = douts[-1]
    wbytes = jnp.dtype(prepared_params[0][0].dtype).itemsize
    rows_per_elem = 1 + mode * nh

    # Batch tile: multiple of 8 sublanes, targeting >= row_target MXU rows.
    tb = _ceil_to(max(1, -(-row_target // rows_per_elem)), 8)
    tb = min(tb, _ceil_to(B, 8))
    # Prefer >= 2 tiles when the batch allows it (keeps both v7x TCs busy).
    if B >= 16 and -(-B // tb) < 2:
        tb = max(8, _ceil_to(-(-B // 2), 8))

    def vmem_est(tb_):
        rows_ = tb_ * rows_per_elem
        est = 2 * rows_ * din0 * 4                     # double-buffered inputs
        est += 2 * rows_ * dout_last * 4               # double-buffered outputs
        est += sum(2 * (kpad * d * wbytes + d * 4) for d in douts)
        est += rows_ * kpad * 4                        # persistent scratch slab
        return est

    while tb > 8 and vmem_est(tb) > vmem_budget_bytes:
        tb -= 8

    n_tiles = -(-B // tb)
    Bp = n_tiles * tb
    rows = tb * rows_per_elem

    # ---- pack inputs (one moveaxis per derivative tensor; padded rows are
    #      zeros and stay finite through every supported activation).
    x32 = jnp.asarray(x, jnp.float32)
    xp = jnp.pad(x32, ((0, Bp - B), (0, 0)))
    args = [xp]
    in_specs = [pl.BlockSpec((tb, din0), lambda i: (i, 0))]
    if mode >= 1:
        dxp = jnp.moveaxis(
            jnp.pad(jnp.asarray(dx_dh, jnp.float32),
                    ((0, Bp - B), (0, 0), (0, 0))), -1, 0)      # (nh, Bp, din0)
        args.append(dxp)
        in_specs.append(pl.BlockSpec((nh, tb, din0), lambda i: (0, i, 0)))
    if mode >= 2:
        d2xp = jnp.moveaxis(
            jnp.pad(jnp.asarray(d2x_dh2, jnp.float32),
                    ((0, Bp - B), (0, 0), (0, 0))), -1, 0)
        args.append(d2xp)
        in_specs.append(pl.BlockSpec((nh, tb, din0), lambda i: (0, i, 0)))

    for wt, b2 in prepared_params:
        args += [wt, b2]
        in_specs += [pl.BlockSpec(wt.shape, lambda i: (0, 0)),
                     pl.BlockSpec(b2.shape, lambda i: (0, 0))]

    # ---- separate outputs, j-major layout (no in-kernel slab re-slicing).
    out_shape = [jax.ShapeDtypeStruct((Bp, dout_last), jnp.float32)]
    out_specs = [pl.BlockSpec((tb, dout_last), lambda i: (i, 0))]
    if mode >= 1:
        out_shape.append(jax.ShapeDtypeStruct((nh, Bp, dout_last), jnp.float32))
        out_specs.append(pl.BlockSpec((nh, tb, dout_last), lambda i: (0, i, 0)))
    if mode >= 2:
        out_shape.append(jax.ShapeDtypeStruct((nh, Bp, dout_last), jnp.float32))
        out_specs.append(pl.BlockSpec((nh, tb, dout_last), lambda i: (0, i, 0)))

    # ---- advisory cost estimate for the surrounding XLA schedule.
    total_rows = n_tiles * rows
    flops = 2 * total_rows * sum(kpad * d for d in douts)
    trans_per = {"sigmoid": 1, "tanh": 1, "sin": 2, "siren": 2}
    transcendentals = n_tiles * tb * sum(
        d * trans_per.get(a, 0) for d, a in zip(douts, activations))
    bytes_accessed = (
        4 * (1 + mode * nh) * Bp * din0
        + sum(wt.size * wbytes + b2.size * 4 for wt, b2 in prepared_params)
        + 4 * (1 + mode * nh) * Bp * dout_last)

    kernel = functools.partial(_fused_mlp_kernel, acts=tuple(activations),
                               tb=tb, nh=nh, mode=mode)
    outs = pl.pallas_call(
        kernel,
        out_shape=tuple(out_shape),
        grid_spec=pltpu.PrefetchScalarGridSpec(
            num_scalar_prefetch=0,
            grid=(n_tiles,),
            in_specs=in_specs,
            out_specs=tuple(out_specs),
            scratch_shapes=[pltpu.VMEM((rows, kpad), jnp.float32)]),
        compiler_params=pltpu.CompilerParams(
            dimension_semantics=("parallel",),
            vmem_limit_bytes=48 * 1024 * 1024),
        cost_estimate=pl.CostEstimate(flops=int(flops),
                                      transcendentals=int(transcendentals),
                                      bytes_accessed=int(bytes_accessed)),
    )(*args)

    y = outs[0][:B]
    dy = d2y = None
    if mode >= 1:
        dy = jnp.moveaxis(outs[1], 0, -1)[:B]          # (B, dout, nh)
    if mode >= 2:
        d2y = jnp.moveaxis(outs[2], 0, -1)[:B]
    return y, dy, d2y


# ---------------------------------------------------------------------------
# Parameter init (mirrors torch.nn.Linear default + sine_init /
# first_layer_sine_init for 'siren' layers), deterministic.
# ---------------------------------------------------------------------------
def init_mlp_params(key, in_dim, h_dims, activations):
    params = []
    d_in = in_dim
    for i, (d_out, act) in enumerate(zip(h_dims, activations)):
        key, kw, kb = jax.random.split(key, 3)
        bound = 1.0 / math.sqrt(d_in)
        if act == "siren":
            wb = (30.0 / d_in) if i == 0 else math.sqrt(6.0 / d_in)
        else:
            wb = bound
        w = jax.random.uniform(kw, (d_out, d_in), jnp.float32, -wb, wb)
        b = jax.random.uniform(kb, (d_out,), jnp.float32, -bound, bound)
        params.append((w, b))
        d_in = d_out
    return params


# ---------------------------------------------------------------------------
# Pure-JAX reference.  dot_dtype=None -> full-precision f32 matmuls;
# dot_dtype=jnp.bfloat16 mirrors the kernel's MXU numerics (bf16 operands,
# f32 accumulation) so the kernel can be validated at tight tolerance.
# ---------------------------------------------------------------------------
def mlp_reference(params, activations, x, dx_dh=None, d2x_dh2=None,
                  dot_dtype=None):
    hp = jax.lax.Precision.HIGHEST if dot_dtype is None else None
    cast = (lambda a: a) if dot_dtype is None else (lambda a: a.astype(dot_dtype))
    mode = 0 if dx_dh is None else (1 if d2x_dh2 is None else 2)
    x = jnp.asarray(x, jnp.float32)
    for (w, b), act in zip(params, activations):
        w = jnp.asarray(w, jnp.float32)
        b = jnp.asarray(b, jnp.float32)
        wc = cast(w)
        yl = jnp.dot(cast(x), wc.T, precision=hp,
                     preferred_element_type=jnp.float32) + b
        if mode >= 1:
            dyl = jnp.einsum("oi,bin->bon", wc, cast(dx_dh), precision=hp,
                             preferred_element_type=jnp.float32)
        if mode >= 2:
            d2yl = jnp.einsum("oi,bin->bon", wc, cast(d2x_dh2), precision=hp,
                              preferred_element_type=jnp.float32)
        y, g1, g2 = _act_apply(act, yl, mode)
        x = y
        if mode >= 2:
            d2x_dh2 = g2[..., None] * dyl ** 2 + g1[..., None] * d2yl
        if mode >= 1:
            dx_dh = g1[..., None] * dyl
    return x, dx_dh, d2x_dh2


if __name__ == "__main__":
    B, in_dim, nh = 8, 4, 4
    h_dims = [32, 32, 3]
    activations = ["sin", "tanh", "none"]

    key = jax.random.PRNGKey(0)
    kparam, kx, kdx, kd2x = jax.random.split(key, 4)

    params = init_mlp_params(kparam, in_dim, h_dims, activations)
    prepared = prepare_params(params)           # bf16 W^T, K zero-padded to 128

    x = jax.random.normal(kx, (B, in_dim), jnp.float32)
    dx_dh = jax.random.normal(kdx, (B, in_dim, nh), jnp.float32)
    d2x_dh2 = jax.random.normal(kd2x, (B, in_dim, nh), jnp.float32)

    fwd = jax.jit(lambda a, b, c: mlp_forward(prepared, activations, a, b, c))
    y, dy_dh, d2y_dh2 = fwd(x, dx_dh, d2x_dh2)
    jax.block_until_ready((y, dy_dh, d2y_dh2))

    assert y.shape == (B, h_dims[-1])
    assert dy_dh.shape == (B, h_dims[-1], nh)
    assert d2y_dh2.shape == (B, h_dims[-1], nh)

    # Matched-numerics reference (bf16 MXU operands, f32 accumulation): tight.
    y_m, dy_m, d2y_m = mlp_reference(params, activations, x, dx_dh, d2x_dh2,
                                     dot_dtype=jnp.bfloat16)
    assert jnp.allclose(y, y_m, rtol=2e-3, atol=2e-3)
    assert jnp.allclose(dy_dh, dy_m, rtol=2e-3, atol=2e-3)
    assert jnp.allclose(d2y_dh2, d2y_m, rtol=2e-3, atol=2e-3)

    # Full-precision f32 reference: bf16-MXU quantization stays bounded.
    y_f, dy_f, d2y_f = mlp_reference(params, activations, x, dx_dh, d2x_dh2)

    def nerr(a, b):
        return float(jnp.max(jnp.abs(a - b)) /
                     jnp.maximum(1.0, jnp.max(jnp.abs(b))))

    assert nerr(y, y_f) < 5e-2
    assert nerr(dy_dh, dy_f) < 5e-2
    assert nerr(d2y_dh2, d2y_f) < 5e-2

    # Forward-only specialization (no derivative rows pushed through the slab).
    y_only, dy_none, d2y_none = jax.jit(
        lambda a: mlp_forward(prepared, activations, a))(x)
    jax.block_until_ready(y_only)
    assert dy_none is None and d2y_none is None
    assert jnp.allclose(y_only, y_m, rtol=2e-3, atol=2e-3)

    print("KERNEL_OK")
</pallas_src>

<mosaic_0001>
module attributes {stable_mosaic.version = 11 : i64} {
  func.func @_fused_mlp_kernel(%arg0: i32, %arg1: memref<8x4xf32, #tpu.memory_space<vmem>>, %arg2: memref<4x8x4xf32, #tpu.memory_space<vmem>>, %arg3: memref<4x8x4xf32, #tpu.memory_space<vmem>>, %arg4: memref<128x32xbf16, #tpu.memory_space<vmem>>, %arg5: memref<1x32xf32, #tpu.memory_space<vmem>>, %arg6: memref<128x32xbf16, #tpu.memory_space<vmem>>, %arg7: memref<1x32xf32, #tpu.memory_space<vmem>>, %arg8: memref<128x3xbf16, #tpu.memory_space<vmem>>, %arg9: memref<1x3xf32, #tpu.memory_space<vmem>>, %arg10: memref<8x3xf32, #tpu.memory_space<vmem>>, %arg11: memref<4x8x3xf32, #tpu.memory_space<vmem>>, %arg12: memref<4x8x3xf32, #tpu.memory_space<vmem>>, %arg13: memref<72x128xf32, #tpu.memory_space<vmem>>) attributes {dimension_semantics = [#tpu.dimension_semantics<parallel>], iteration_bounds = array<i64: 1>, scalar_prefetch = 0 : i64, scratch_operands = 1 : i64, tpu.core_type = #tpu.core_type<tc>, window_params = [{transform_indices = @transform_0, window_bounds = array<i64: 8, 4>}, {transform_indices = @transform_1, window_bounds = array<i64: 4, 8, 4>}, {transform_indices = @transform_2, window_bounds = array<i64: 4, 8, 4>}, {pipeline_mode = #tpu.pipeline_mode<synchronous>, transform_indices = @transform_3, window_bounds = array<i64: 128, 32>}, {pipeline_mode = #tpu.pipeline_mode<synchronous>, transform_indices = @transform_4, window_bounds = array<i64: 1, 32>}, {pipeline_mode = #tpu.pipeline_mode<synchronous>, transform_indices = @transform_5, window_bounds = array<i64: 128, 32>}, {pipeline_mode = #tpu.pipeline_mode<synchronous>, transform_indices = @transform_6, window_bounds = array<i64: 1, 32>}, {pipeline_mode = #tpu.pipeline_mode<synchronous>, transform_indices = @transform_7, window_bounds = array<i64: 128, 3>}, {pipeline_mode = #tpu.pipeline_mode<synchronous>, transform_indices = @transform_8, window_bounds = array<i64: 1, 3>}, {transform_indices = @transform_9, window_bounds = array<i64: 8, 3>}, {transform_indices = @transform_10, window_bounds = array<i64: 4, 8, 3>}, {transform_indices = @transform_11, window_bounds = array<i64: 4, 8, 3>}]} {
    %cst = arith.constant 0.000000e+00 : f32
    %0 = vector.broadcast %cst : f32 to vector<72x128xf32>
    %c0 = arith.constant 0 : index
    %c0_0 = arith.constant 0 : index
    %1 = vector.load %arg13[%c0, %c0_0] : memref<72x128xf32, #tpu.memory_space<vmem>>, vector<72x128xf32>
    tpu.vector_store %arg13[%c0, %c0_0], %0 {strides = array<i32>} : memref<72x128xf32, #tpu.memory_space<vmem>>, vector<72x128xf32>,
    %c0_1 = arith.constant 0 : index
    %c0_2 = arith.constant 0 : index
    %2 = vector.load %arg1[%c0_1, %c0_2] : memref<8x4xf32, #tpu.memory_space<vmem>>, vector<8x4xf32>
    %c0_3 = arith.constant 0 : index
    %c0_4 = arith.constant 0 : index
    %3 = vector.load %arg13[%c0_3, %c0_4] : memref<72x128xf32, #tpu.memory_space<vmem>>, vector<8x4xf32>
    tpu.vector_store %arg13[%c0_3, %c0_4], %2 {strides = array<i32>} : memref<72x128xf32, #tpu.memory_space<vmem>>, vector<8x4xf32>,
    %c0_5 = arith.constant 0 : index
    %c0_6 = arith.constant 0 : index
    %c0_7 = arith.constant 0 : index
    %4 = vector.load %arg2[%c0_5, %c0_6, %c0_7] : memref<4x8x4xf32, #tpu.memory_space<vmem>>, vector<4x8x4xf32>
    %5 = vector.shape_cast %4 : vector<4x8x4xf32> to vector<32x4xf32>
    %c8 = arith.constant 8 : index
    %c0_8 = arith.constant 0 : index
    %6 = vector.load %arg13[%c8, %c0_8] : memref<72x128xf32, #tpu.memory_space<vmem>>, vector<32x4xf32>
    tpu.vector_store %arg13[%c8, %c0_8], %5 {strides = array<i32>} : memref<72x128xf32, #tpu.memory_space<vmem>>, vector<32x4xf32>,
    %c0_9 = arith.constant 0 : index
    %c0_10 = arith.constant 0 : index
    %c0_11 = arith.constant 0 : index
    %7 = vector.load %arg3[%c0_9, %c0_10, %c0_11] : memref<4x8x4xf32, #tpu.memory_space<vmem>>, vector<4x8x4xf32>
    %8 = vector.shape_cast %7 : vector<4x8x4xf32> to vector<32x4xf32>
    %c40 = arith.constant 40 : index
    %c0_12 = arith.constant 0 : index
    %9 = vector.load %arg13[%c40, %c0_12] : memref<72x128xf32, #tpu.memory_space<vmem>>, vector<32x4xf32>
    tpu.vector_store %arg13[%c40, %c0_12], %8 {strides = array<i32>} : memref<72x128xf32, #tpu.memory_space<vmem>>, vector<32x4xf32>,
    %c0_13 = arith.constant 0 : index
    %c0_14 = arith.constant 0 : index
    %10 = vector.load %arg4[%c0_13, %c0_14] : memref<128x32xbf16, #tpu.memory_space<vmem>>, vector<128x32xbf16>
    %c0_15 = arith.constant 0 : index
    %c0_16 = arith.constant 0 : index
    %11 = vector.load %arg5[%c0_15, %c0_16] : memref<1x32xf32, #tpu.memory_space<vmem>>, vector<1x32xf32>
    %c0_17 = arith.constant 0 : index
    %c0_18 = arith.constant 0 : index
    %12 = vector.load %arg13[%c0_17, %c0_18] : memref<72x128xf32, #tpu.memory_space<vmem>>, vector<72x128xf32>
    %13 = arith.truncf %12 : vector<72x128xf32> to vector<72x128xbf16>
    %cst_19 = arith.constant dense<0.000000e+00> : vector<72x32xf32>
    %14 = tpu.matmul %13, %10, %cst_19 {dimension_numbers = #tpu.dot_dimension_numbers<[1], [0], [0], [1], [0, 0, 1, 1], [], []>} : vector<72x128xbf16>, vector<128x32xbf16>, vector<72x32xf32> -> vector<72x32xf32>
    %15 = vector.shape_cast %14 : vector<72x32xf32> to vector<9x8x32xf32>
    %16 = vector.extract_strided_slice %15 {offsets = [0, 0, 0], sizes = [1, 8, 32], strides = [1, 1, 1]} : vector<9x8x32xf32> to vector<1x8x32xf32>
    %17 = vector.shape_cast %16 : vector<1x8x32xf32> to vector<8x32xf32>
    %18 = vector.broadcast %11 : vector<1x32xf32> to vector<8x32xf32>
    %19 = arith.addf %17, %18 : vector<8x32xf32>
    %20 = math.sin %19 : vector<8x32xf32>
    %21 = math.cos %19 : vector<8x32xf32>
    %cst_20 = arith.constant 0.000000e+00 : f32
    %22 = vector.broadcast %cst_20 : f32 to vector<8x32xf32>
    %23 = arith.subf %22, %20 : vector<8x32xf32>
    %24 = vector.extract_strided_slice %15 {offsets = [1, 0, 0], sizes = [4, 8, 32], strides = [1, 1, 1]} : vector<9x8x32xf32> to vector<4x8x32xf32>
    %25 = vector.shape_cast %21 : vector<8x32xf32> to vector<1x8x32xf32>
    %26 = vector.broadcast %25 : vector<1x8x32xf32> to vector<4x8x32xf32>
    %27 = arith.mulf %26, %24 : vector<4x8x32xf32>
    %28 = vector.extract_strided_slice %15 {offsets = [5, 0, 0], sizes = [4, 8, 32], strides = [1, 1, 1]} : vector<9x8x32xf32> to vector<4x8x32xf32>
    %29 = vector.shape_cast %23 : vector<8x32xf32> to vector<1x8x32xf32>
    %30 = arith.mulf %24, %24 : vector<4x8x32xf32>
    %31 = vector.broadcast %29 : vector<1x8x32xf32> to vector<4x8x32xf32>
    %32 = arith.mulf %31, %30 : vector<4x8x32xf32>
    %33 = vector.shape_cast %21 : vector<8x32xf32> to vector<1x8x32xf32>
    %34 = vector.broadcast %33 : vector<1x8x32xf32> to vector<4x8x32xf32>
    %35 = arith.mulf %34, %28 : vector<4x8x32xf32>
    %36 = arith.addf %32, %35 : vector<4x8x32xf32>
    %c0_21 = arith.constant 0 : index
    %c0_22 = arith.constant 0 : index
    %37 = vector.load %arg13[%c0_21, %c0_22] : memref<72x128xf32, #tpu.memory_space<vmem>>, vector<8x32xf32>
    tpu.vector_store %arg13[%c0_21, %c0_22], %20 {strides = array<i32>} : memref<72x128xf32, #tpu.memory_space<vmem>>, vector<8x32xf32>,
    %38 = vector.shape_cast %27 : vector<4x8x32xf32> to vector<32x32xf32>
    %c8_23 = arith.constant 8 : index
    %c0_24 = arith.constant 0 : index
    %39 = vector.load %arg13[%c8_23, %c0_24] : memref<72x128xf32, #tpu.memory_space<vmem>>, vector<32x32xf32>
    tpu.vector_store %arg13[%c8_23, %c0_24], %38 {strides = array<i32>} : memref<72x128xf32, #tpu.memory_space<vmem>>, vector<32x32xf32>,
    %40 = vector.shape_cast %36 : vector<4x8x32xf32> to vector<32x32xf32>
    %c40_25 = arith.constant 40 : index
    %c0_26 = arith.constant 0 : index
    %41 = vector.load %arg13[%c40_25, %c0_26] : memref<72x128xf32, #tpu.memory_space<vmem>>, vector<32x32xf32>
    tpu.vector_store %arg13[%c40_25, %c0_26], %40 {strides = array<i32>} : memref<72x128xf32, #tpu.memory_space<vmem>>, vector<32x32xf32>,
    %c0_27 = arith.constant 0 : index
    %c0_28 = arith.constant 0 : index
    %42 = vector.load %arg6[%c0_27, %c0_28] : memref<128x32xbf16, #tpu.memory_space<vmem>>, vector<128x32xbf16>
    %c0_29 = arith.constant 0 : index
    %c0_30 = arith.constant 0 : index
    %43 = vector.load %arg7[%c0_29, %c0_30] : memref<1x32xf32, #tpu.memory_space<vmem>>, vector<1x32xf32>
    %c0_31 = arith.constant 0 : index
    %c0_32 = arith.constant 0 : index
    %44 = vector.load %arg13[%c0_31, %c0_32] : memref<72x128xf32, #tpu.memory_space<vmem>>, vector<72x128xf32>
    %45 = arith.truncf %44 : vector<72x128xf32> to vector<72x128xbf16>
    %cst_33 = arith.constant dense<0.000000e+00> : vector<72x32xf32>
    %46 = tpu.matmul %45, %42, %cst_33 {dimension_numbers = #tpu.dot_dimension_numbers<[1], [0], [0], [1], [0, 0, 1, 1], [], []>} : vector<72x128xbf16>, vector<128x32xbf16>, vector<72x32xf32> -> vector<72x32xf32>
    %47 = vector.shape_cast %46 : vector<72x32xf32> to vector<9x8x32xf32>
    %48 = vector.extract_strided_slice %47 {offsets = [0, 0, 0], sizes = [1, 8, 32], strides = [1, 1, 1]} : vector<9x8x32xf32> to vector<1x8x32xf32>
    %49 = vector.shape_cast %48 : vector<1x8x32xf32> to vector<8x32xf32>
    %50 = vector.broadcast %43 : vector<1x32xf32> to vector<8x32xf32>
    %51 = arith.addf %49, %50 : vector<8x32xf32>
    %52 = math.tanh %51 : vector<8x32xf32>
    %53 = arith.mulf %52, %52 : vector<8x32xf32>
    %cst_34 = arith.constant 1.000000e+00 : f32
    %54 = vector.broadcast %cst_34 : f32 to vector<8x32xf32>
    %55 = arith.subf %54, %53 : vector<8x32xf32>
    %cst_35 = arith.constant -2.000000e+00 : f32
    %56 = vector.broadcast %cst_35 : f32 to vector<8x32xf32>
    %57 = arith.mulf %56, %52 : vector<8x32xf32>
    %58 = arith.mulf %57, %55 : vector<8x32xf32>
    %59 = vector.extract_strided_slice %47 {offsets = [1, 0, 0], sizes = [4, 8, 32], strides = [1, 1, 1]} : vector<9x8x32xf32> to vector<4x8x32xf32>
    %60 = vector.shape_cast %55 : vector<8x32xf32> to vector<1x8x32xf32>
    %61 = vector.broadcast %60 : vector<1x8x32xf32> to vector<4x8x32xf32>
    %62 = arith.mulf %61, %59 : vector<4x8x32xf32>
    %63 = vector.extract_strided_slice %47 {offsets = [5, 0, 0], sizes = [4, 8, 32], strides = [1, 1, 1]} : vector<9x8x32xf32> to vector<4x8x32xf32>
    %64 = vector.shape_cast %58 : vector<8x32xf32> to vector<1x8x32xf32>
    %65 = arith.mulf %59, %59 : vector<4x8x32xf32>
    %66 = vector.broadcast %64 : vector<1x8x32xf32> to vector<4x8x32xf32>
    %67 = arith.mulf %66, %65 : vector<4x8x32xf32>
    %68 = vector.shape_cast %55 : vector<8x32xf32> to vector<1x8x32xf32>
    %69 = vector.broadcast %68 : vector<1x8x32xf32> to vector<4x8x32xf32>
    %70 = arith.mulf %69, %63 : vector<4x8x32xf32>
    %71 = arith.addf %67, %70 : vector<4x8x32xf32>
    %c0_36 = arith.constant 0 : index
    %c0_37 = arith.constant 0 : index
    %72 = vector.load %arg13[%c0_36, %c0_37] : memref<72x128xf32, #tpu.memory_space<vmem>>, vector<8x32xf32>
    tpu.vector_store %arg13[%c0_36, %c0_37], %52 {strides = array<i32>} : memref<72x128xf32, #tpu.memory_space<vmem>>, vector<8x32xf32>,
    %73 = vector.shape_cast %62 : vector<4x8x32xf32> to vector<32x32xf32>
    %c8_38 = arith.constant 8 : index
    %c0_39 = arith.constant 0 : index
    %74 = vector.load %arg13[%c8_38, %c0_39] : memref<72x128xf32, #tpu.memory_space<vmem>>, vector<32x32xf32>
    tpu.vector_store %arg13[%c8_38, %c0_39], %73 {strides = array<i32>} : memref<72x128xf32, #tpu.memory_space<vmem>>, vector<32x32xf32>,
    %75 = vector.shape_cast %71 : vector<4x8x32xf32> to vector<32x32xf32>
    %c40_40 = arith.constant 40 : index
    %c0_41 = arith.constant 0 : index
    %76 = vector.load %arg13[%c40_40, %c0_41] : memref<72x128xf32, #tpu.memory_space<vmem>>, vector<32x32xf32>
    tpu.vector_store %arg13[%c40_40, %c0_41], %75 {strides = array<i32>} : memref<72x128xf32, #tpu.memory_space<vmem>>, vector<32x32xf32>,
    %c0_42 = arith.constant 0 : index
    %c0_43 = arith.constant 0 : index
    %77 = vector.load %arg8[%c0_42, %c0_43] : memref<128x3xbf16, #tpu.memory_space<vmem>>, vector<128x3xbf16>
    %c0_44 = arith.constant 0 : index
    %c0_45 = arith.constant 0 : index
    %78 = vector.load %arg9[%c0_44, %c0_45] : memref<1x3xf32, #tpu.memory_space<vmem>>, vector<1x3xf32>
    %c0_46 = arith.constant 0 : index
    %c0_47 = arith.constant 0 : index
    %79 = vector.load %arg13[%c0_46, %c0_47] : memref<72x128xf32, #tpu.memory_space<vmem>>, vector<72x128xf32>
    %80 = arith.truncf %79 : vector<72x128xf32> to vector<72x128xbf16>
    %cst_48 = arith.constant dense<0.000000e+00> : vector<72x3xf32>
    %81 = tpu.matmul %80, %77, %cst_48 {dimension_numbers = #tpu.dot_dimension_numbers<[1], [0], [0], [1], [0, 0, 1, 1], [], []>} : vector<72x128xbf16>, vector<128x3xbf16>, vector<72x3xf32> -> vector<72x3xf32>
    %82 = vector.shape_cast %81 : vector<72x3xf32> to vector<9x8x3xf32>
    %83 = vector.extract_strided_slice %82 {offsets = [0, 0, 0], sizes = [1, 8, 3], strides = [1, 1, 1]} : vector<9x8x3xf32> to vector<1x8x3xf32>
    %84 = vector.shape_cast %83 : vector<1x8x3xf32> to vector<8x3xf32>
    %85 = vector.broadcast %78 : vector<1x3xf32> to vector<8x3xf32>
    %86 = arith.addf %84, %85 : vector<8x3xf32>
    %cst_49 = arith.constant 1.000000e+00 : f32
    %87 = vector.broadcast %cst_49 : f32 to vector<8x3xf32>
    %cst_50 = arith.constant 0.000000e+00 : f32
    %88 = vector.broadcast %cst_50 : f32 to vector<8x3xf32>
    %89 = vector.extract_strided_slice %82 {offsets = [1, 0, 0], sizes = [4, 8, 3], strides = [1, 1, 1]} : vector<9x8x3xf32> to vector<4x8x3xf32>
    %90 = vector.shape_cast %87 : vector<8x3xf32> to vector<1x8x3xf32>
    %91 = vector.broadcast %90 : vector<1x8x3xf32> to vector<4x8x3xf32>
    %92 = arith.mulf %91, %89 : vector<4x8x3xf32>
    %93 = vector.extract_strided_slice %82 {offsets = [5, 0, 0], sizes = [4, 8, 3], strides = [1, 1, 1]} : vector<9x8x3xf32> to vector<4x8x3xf32>
    %94 = vector.shape_cast %88 : vector<8x3xf32> to vector<1x8x3xf32>
    %95 = arith.mulf %89, %89 : vector<4x8x3xf32>
    %96 = vector.broadcast %94 : vector<1x8x3xf32> to vector<4x8x3xf32>
    %97 = arith.mulf %96, %95 : vector<4x8x3xf32>
    %98 = vector.shape_cast %87 : vector<8x3xf32> to vector<1x8x3xf32>
    %99 = vector.broadcast %98 : vector<1x8x3xf32> to vector<4x8x3xf32>
    %100 = arith.mulf %99, %93 : vector<4x8x3xf32>
    %101 = arith.addf %97, %100 : vector<4x8x3xf32>
    %c0_51 = arith.constant 0 : index
    %c0_52 = arith.constant 0 : index
    %102 = vector.load %arg10[%c0_51, %c0_52] : memref<8x3xf32, #tpu.memory_space<vmem>>, vector<8x3xf32>
    tpu.vector_store %arg10[%c0_51, %c0_52], %86 {strides = array<i32>} : memref<8x3xf32, #tpu.memory_space<vmem>>, vector<8x3xf32>,
    %c0_53 = arith.constant 0 : index
    %c0_54 = arith.constant 0 : index
    %c0_55 = arith.constant 0 : index
    %103 = vector.load %arg11[%c0_53, %c0_54, %c0_55] : memref<4x8x3xf32, #tpu.memory_space<vmem>>, vector<4x8x3xf32>
    tpu.vector_store %arg11[%c0_53, %c0_54, %c0_55], %92 {strides = array<i32>} : memref<4x8x3xf32, #tpu.memory_space<vmem>>, vector<4x8x3xf32>,
    %c0_56 = arith.constant 0 : index
    %c0_57 = arith.constant 0 : index
    %c0_58 = arith.constant 0 : index
    %104 = vector.load %arg12[%c0_56, %c0_57, %c0_58] : memref<4x8x3xf32, #tpu.memory_space<vmem>>, vector<4x8x3xf32>
    tpu.vector_store %arg12[%c0_56, %c0_57, %c0_58], %101 {strides = array<i32>} : memref<4x8x3xf32, #tpu.memory_space<vmem>>, vector<4x8x3xf32>,
    return
  }
  func.func @transform_0(%arg0: i32) -> (i32, i32) {
    %c0_i32 = arith.constant 0 : i32
    %c0_i32_0 = arith.constant 0 : i32
    return %arg0, %c0_i32 : i32, i32
  }
  func.func @transform_1(%arg0: i32) -> (i32, i32, i32) {
    %c0_i32 = arith.constant 0 : i32
    %c0_i32_0 = arith.constant 0 : i32
    %c0_i32_1 = arith.constant 0 : i32
    return %c0_i32, %arg0, %c0_i32_0 : i32, i32, i32
  }
  func.func @transform_2(%arg0: i32) -> (i32, i32, i32) {
    %c0_i32 = arith.constant 0 : i32
    %c0_i32_0 = arith.constant 0 : i32
    %c0_i32_1 = arith.constant 0 : i32
    return %c0_i32, %arg0, %c0_i32_0 : i32, i32, i32
  }
  func.func @transform_3(%arg0: i32) -> (i32, i32) {
    %c0_i32 = arith.constant 0 : i32
    %c0_i32_0 = arith.constant 0 : i32
    %c0_i32_1 = arith.constant 0 : i32
    return %c0_i32, %c0_i32_0 : i32, i32
  }
  func.func @transform_4(%arg0: i32) -> (i32, i32) {
    %c0_i32 = arith.constant 0 : i32
    %c0_i32_0 = arith.constant 0 : i32
    %c0_i32_1 = arith.constant 0 : i32
    return %c0_i32, %c0_i32_0 : i32, i32
  }
  func.func @transform_5(%arg0: i32) -> (i32, i32) {
    %c0_i32 = arith.constant 0 : i32
    %c0_i32_0 = arith.constant 0 : i32
    %c0_i32_1 = arith.constant 0 : i32
    return %c0_i32, %c0_i32_0 : i32, i32
  }
  func.func @transform_6(%arg0: i32) -> (i32, i32) {
    %c0_i32 = arith.constant 0 : i32
    %c0_i32_0 = arith.constant 0 : i32
    %c0_i32_1 = arith.constant 0 : i32
    return %c0_i32, %c0_i32_0 : i32, i32
  }
  func.func @transform_7(%arg0: i32) -> (i32, i32) {
    %c0_i32 = arith.constant 0 : i32
    %c0_i32_0 = arith.constant 0 : i32
    %c0_i32_1 = arith.constant 0 : i32
    return %c0_i32, %c0_i32_0 : i32, i32
  }
  func.func @transform_8(%arg0: i32) -> (i32, i32) {
    %c0_i32 = arith.constant 0 : i32
    %c0_i32_0 = arith.constant 0 : i32
    %c0_i32_1 = arith.constant 0 : i32
    return %c0_i32, %c0_i32_0 : i32, i32
  }
  func.func @transform_9(%arg0: i32) -> (i32, i32) {
    %c0_i32 = arith.constant 0 : i32
    %c0_i32_0 = arith.constant 0 : i32
    return %arg0, %c0_i32 : i32, i32
  }
  func.func @transform_10(%arg0: i32) -> (i32, i32, i32) {
    %c0_i32 = arith.constant 0 : i32
    %c0_i32_0 = arith.constant 0 : i32
    %c0_i32_1 = arith.constant 0 : i32
    return %c0_i32, %arg0, %c0_i32_0 : i32, i32, i32
  }
  func.func @transform_11(%arg0: i32) -> (i32, i32, i32) {
    %c0_i32 = arith.constant 0 : i32
    %c0_i32_0 = arith.constant 0 : i32
    %c0_i32_1 = arith.constant 0 : i32
    return %c0_i32, %arg0, %c0_i32_0 : i32, i32, i32
  }
}

</mosaic_0001>

<bundles_post_ra>
// kernel: _lambda_.1
= control target key start
LH: loop header
LB: loop body
LE: loop exit
PB: predicated region body
PF: predicated region fallthrough
CT: control target
= control target key end

     0   :  { %17 = vsyncpa [#allocation4], 0  ;;  %s1352_s0 = inlined_call_operand.vmem [shape: f32[8,4], index: 0, kind: input, shape index: {}]   ;;  %s1353_s1 = inlined_call_operand.vmem [shape: f32[4,8,4], index: 1, kind: input, shape index: {}]   ;;  %s1354_s2 = inlined_call_operand.vmem [shape: f32[4,8,4], index: 2, kind: input, shape index: {}]   ;;  %s1355_s3 = inlined_call_operand.hbm [shape: bf16[128,32], index: 3, kind: input, shape index: {}]   ;;  %s1356_s4 = inlined_call_operand.vmem [shape: f32[1,32], index: 4, kind: input, shape index: {}]   ;;  %s1357_s5 = inlined_call_operand.hbm [shape: bf16[128,32], index: 5, kind: input, shape index: {}]   ;;  %s1358_s6 = inlined_call_operand.vmem [shape: f32[1,32], index: 6, kind: input, shape index: {}]   ;;  %s1359_s7 = inlined_call_operand.vmem [shape: bf16[128,3], index: 7, kind: input, shape index: {}]   ;;  %s1360_s8 = inlined_call_operand.vmem [shape: f32[1,3], index: 8, kind: input, shape index: {}]   ;;  %s1361_s9 = inlined_call_operand.vmem [shape: f32[8,3], index: 9, kind: output, shape index: {0}]   ;;  %s1362_s10 = inlined_call_operand.vmem [shape: f32[4,8,3], index: 10, kind: output, shape index: {1}]   ;;  %s1363_s11 = inlined_call_operand.vmem [shape: f32[4,8,3], index: 11, kind: output, shape index: {2}]  }
   0x1   :  { %s29_s19 = sshll.u32 %s1355_s3, 4  ;;  %s30_s19 = int_to_ptr.hbm [resolvable:$true] %s29_s19 }
   0x2   :  { %18 = vsyncpa [#allocation6], 0  ;;  %s1064_s20 = smov [#allocation3]   ;;  %s44_s24 = sshll.u32 %s1357_s5, 4  ;;  %s45_s24 = int_to_ptr.hbm [resolvable:$true] %s44_s24 }
   0x3   :  { %s31_s21 = sshll.u32 %s1064_s20, 4  ;;  %s1065_s25 = smov 64   ;;  %s32_s21 = int_to_ptr.vmem [resolvable:$true] %s31_s21 }
   0x4   :  { %s1066_s26 = smov 4   ;;  %s1067_s27 = smov [#allocation5]  }
   0x5   :  { %37 = dma.hbm_to_vmem [thread:$0]  %s30_s19, 1024, %s32_s21, [#allocation4], %s1065_s25, %s1065_s25, %s1066_s26  }
   0x6   :  { %s46_s28 = sshll.u32 %s1067_s27, 4  ;;  %s47_s28 = int_to_ptr.vmem [resolvable:$true] %s46_s28 }
   0x7   :  { %52 = dma.hbm_to_vmem [thread:$0]  %s45_s24, 1024, %s47_s28, [#allocation6], %s1065_s25, %s1065_s25, %s1066_s26  }
   0x8   :  { %1060 = dma.done.wait [#allocation4], 1024  }
   0x9   :  { %1061 = vsyncadd [#allocation4], 4294966272 }
   0xa   :  { %1062 = dma.done.wait [#allocation6], 1024  }
   0xb   :  { %1063 = vsyncadd [#allocation6], 4294966272  ;;  %v1068_v0 = vmov 0.0   ;;  %v962_v1 = vld [vmem:[#allocation3 + $0x38] sm:$0xff]  ;;  %vm77_vm0 = vcmask 31744   ;;  %v961_v2 = vld [vmem:[#allocation3 + $0x30] sm:$0xff] }
   0xc   :  { %67 = vst [vmem:[#allocation2] sm:$0xff] %v1068_v0  ;;  %174 = vmatpush.bf16.msra.mxu0 %v962_v1  ;;  %v76_v3 = vld [vmem:[%s1352_s0] sm:$0xff]  ;;  %979 = vmatpush.bf16.msra.mxu3 %v962_v1  ;;  %v80_v5 = vld [vmem:[%s1353_s1 + $0x8] sm:$0xff]  ;;  %v81_v6 = vld [vmem:[%s1353_s1 + $0x10] sm:$0xff]  ;;  %v1069_v46 = vmov 683565275  }
   0xd   :  { %68 = vst [vmem:[#allocation2 + $0x8] sm:$0xff] %v1068_v0  ;;  %v79_v4 = vld [vmem:[%s1353_s1] sm:$0xff]  ;;  %v82_v7 = vld [vmem:[%s1353_s1 + $0x18] sm:$0xff]  ;;  %v960_v9 = vld [vmem:[#allocation3 + $0x28] sm:$0xff]  ;;  %v1070_v48 = vmov 2475754826  }
   0xe   :  { %69 = vst [vmem:[#allocation2 + $0x10] sm:$0xff] %v1068_v0  ;;  %v87_v8 = vld [vmem:[%s1354_s2] sm:$0xff]  ;;  %v959_v10 = vld [vmem:[#allocation3 + $0x20] sm:$0xff]  ;;  %v89_v13 = vld [vmem:[%s1354_s2 + $0x10] sm:$0xff]  ;;  %v1071_v51 = vmov 2131351028  }
   0xf   :  { %70 = vst [vmem:[#allocation2 + $0x18] sm:$0xff] %v1068_v0  ;;  %v958_v11 = vld [vmem:[#allocation3 + $0x18] sm:$0xff]  ;;  %v88_v12 = vld [vmem:[%s1354_s2 + $0x8] sm:$0xff]  ;;  %v957_v14 = vld [vmem:[#allocation3 + $0x10] sm:$0xff]  ;;  %v1072_v54 = vmov 2102212464  }
  0x10   :  { %71 = vst [vmem:[#allocation2 + $0x20] sm:$0xff] %v1068_v0  ;;  %175 = vmatpush.bf16.msra.mxu0 %v961_v2  ;;  %980 = vmatpush.bf16.msra.mxu3 %v961_v2  ;;  %v956_v15 = vld [vmem:[#allocation3 + $0x8] sm:$0xff]  ;;  %v955_v16 = vld [vmem:[#allocation3] sm:$0xff]  ;;  %v90_v23 = vld [vmem:[%s1354_s2 + $0x18] sm:$0xff]  ;;  %v1073_v57 = vmov 920167782  }
  0x11   :  { %72 = vst [vmem:[#allocation2 + $0x28] sm:$0xff] %v1068_v0  ;;  %v1007_v32 = vld [vmem:[%s1356_s4] ss:$0 sm:$0xff]  ;;  %v1074_v60 = vmov 1326507024  }
  0x12   :  { %73 = vst [vmem:[#allocation2 + $0x30] sm:$0xff] %v1068_v0 }
  0x13   :  { %74 = vst [vmem:[#allocation2 + $0x38] sm:$0xff] %v1068_v0 }
  0x14   :  { %75 = vst [vmem:[#allocation2 + $0x40] sm:$0xff] %v1068_v0  ;;  %176 = vmatpush.bf16.msra.mxu0 %v960_v9  ;;  %981 = vmatpush.bf16.msra.mxu3 %v960_v9 }
  0x15   :  { %78 = vst.msk [vmem:[#allocation2] sm:$0xff] %vm77_vm0, %v76_v3 }
  0x16   :  { %83 = vst.msk [vmem:[#allocation2 + $0x8] sm:$0xff] %vm77_vm0, %v79_v4 }
  0x17   :  { %84 = vst.msk [vmem:[#allocation2 + $0x10] sm:$0xff] %vm77_vm0, %v80_v5 }
  0x18   :  { %85 = vst.msk [vmem:[#allocation2 + $0x18] sm:$0xff] %vm77_vm0, %v81_v6  ;;  %177 = vmatpush.bf16.msra.mxu0 %v959_v10  ;;  %982 = vmatpush.bf16.msra.mxu3 %v959_v10 }
  0x19   :  { %86 = vst.msk [vmem:[#allocation2 + $0x20] sm:$0xff] %vm77_vm0, %v82_v7 }
  0x1a   :  { %91 = vst.msk [vmem:[#allocation2 + $0x28] sm:$0xff] %vm77_vm0, %v87_v8 }
  0x1b   :  { %92 = vst.msk [vmem:[#allocation2 + $0x30] sm:$0xff] %vm77_vm0, %v88_v12 }
  0x1c   :  { %178 = vmatpush.bf16.msra.mxu0 %v958_v11  ;;  %983 = vmatpush.bf16.msra.mxu3 %v958_v11  ;;  %93 = vst.msk [vmem:[#allocation2 + $0x38] sm:$0xff] %vm77_vm0, %v89_v13  ;;  %v112_v17 = vld [vmem:[#allocation2] sm:$0xff] }
  0x1d   :  { %v113_v18 = vld [vmem:[#allocation2 + $0x8] sm:$0xff]  ;;  %94 = vst.msk [vmem:[#allocation2 + $0x40] sm:$0xff] %vm77_vm0, %v90_v23 }
  0x1e   :  { %v114_v19 = vld [vmem:[#allocation2 + $0x10] sm:$0xff]  ;;  %v121_v21 = vpack.c.bf16 %v113_v18, %v112_v17 }
  0x1f   :  { %v115_v20 = vld [vmem:[#allocation2 + $0x18] sm:$0xff] }
  0x20   :  { %179 = vmatpush.bf16.msra.mxu0 %v957_v14  ;;  %984 = vmatpush.bf16.msra.mxu3 %v957_v14  ;;  %v122_v22 = vpack.c.bf16 %v115_v20, %v114_v19  ;;  %v116_v24 = vld [vmem:[#allocation2 + $0x20] sm:$0xff] }
  0x21   :  { %v117_v25 = vld [vmem:[#allocation2 + $0x28] sm:$0xff] }
  0x22   :  { %v123_v26 = vpack.c.bf16 %v117_v25, %v116_v24  ;;  %v118_v27 = vld [vmem:[#allocation2 + $0x30] sm:$0xff] }
  0x23   :  { %v119_v28 = vld [vmem:[#allocation2 + $0x38] sm:$0xff] }
  0x24   :  { %180 = vmatpush.bf16.msra.mxu0 %v956_v15  ;;  %985 = vmatpush.bf16.msra.mxu3 %v956_v15  ;;  %v124_v29 = vpack.c.bf16 %v119_v28, %v118_v27  ;;  %v120_v30 = vld [vmem:[#allocation2 + $0x40] sm:$0xff] }
  0x25   :  { %v125_v31 = vpack.c.bf16 %v120_v30, %v120_v30 }
  0x28   :  { %181 = vmatpush.bf16.msra.mxu0 %v955_v16  ;;  %986 = vmatpush.bf16.msra.mxu3 %v955_v16 }
  0x2b   :  { %182 = vmatmul.bf16.vlgmr.msra.gmra.mxu0 %v121_v21  ;;  %187 = vmatmul.bf16.vlgmr.msra.gmra.mxu3 %v122_v22 }
  0x3b   :  { %192 = vmatmul.bf16.gmra.mxu3 %v123_v26 }
  0x4b   :  { %197 = vmatmul.bf16.gmra.mxu3 %v124_v29 }
  0x5b   :  { %202 = vmatmul.bf16.gmra.mxu3 %v125_v31 }
  0xa8   :  { %v183_v33 = vpop.f32.mrf.mxu0 }
  0xa9   :  { %v1181_v34 = vadd.f32 %v1007_v32, %v183_v33  ;;  %v1075_v32 = vmov 0  }
  0xab   :  { %v214_v35 = vand.u32 2139095040, %v1181_v34  ;;  %v211_v38 = vand.u32 2147483647, %v1181_v34  ;;  %vm213_vm13 = vcmp.lt.s32.totalorder %v1181_v34, 0  ;;  %vm354_vm15 = vweird.f32 %v1181_v34 }
  0xad   :  { %v215_v36 = vshrl.u32 %v214_v35, 23  ;;  %v218_v40 = vand.u32 8388607, %v211_v38  ;;  %vm212_vm14 = vcmp.le.f32.partialorder %v211_v38, 0.7853982 }
  0xae   :  { %v1205_v6 = vpop.f32.mrf.mxu3 }
  0xaf   :  { %v885_v37 = vadd.s32 4294967169, %v215_v36  ;;  %v219_v44 = vor.u32 8388608, %v218_v40 }
  0xb1   :  { %v221_v39 = vadd.s32 1, %v885_v37  ;;  %v1198_v3 = vshll.u32 %v219_v44, 8 }
  0xb3   :  { %vm222_vm1 = vcmp.gt.s32.totalorder %v221_v39, 0  ;;  %v260_v13 = vand.u32 65535, %v1198_v3  ;;  %v261_v14 = vshrl.u32 %v1198_v3, 16 }
  0xb4   :  { %v223_v41 = vsel %vm222_vm1, %v221_v39, 0 }
  0xb5   :  { %v225_v42 = vand.u32 31, %v223_v41  ;;  %v1189_v45 = vshrl.u32 %v223_v41, 5 }
  0xb6   :  { %v1223_v25 = vpop.f32.mrf.mxu3 }
  0xb7   :  { %v1187_v43 = vsub.s32 32, %v225_v42  ;;  %v228_v47 = vshll.u32 %v1069_v46, %v225_v42  ;;  %v231_v49 = vshll.u32 %v1070_v48, %v225_v42  ;;  %v234_v53 = vshll.u32 %v1071_v51, %v225_v42 }
  0xb8   :  { %v237_v56 = vshll.u32 %v1072_v54, %v225_v42  ;;  %v240_v59 = vshll.u32 %v1073_v57, %v225_v42  ;;  %vm243_vm2 = vcmp.lt.s32.totalorder %v1189_v45, 1  ;;  %vm246_vm3 = vcmp.lt.s32.totalorder %v1189_v45, 4 }
  0xb9   :  { %v229_v50 = vshrl.u32 %v1070_v48, %v1187_v43  ;;  %v232_v52 = vshrl.u32 %v1071_v51, %v1187_v43  ;;  %v235_v55 = vshrl.u32 %v1072_v54, %v1187_v43  ;;  %v238_v58 = vshrl.u32 %v1073_v57, %v1187_v43 }
  0xba   :  { %v241_v61 = vshrl.u32 %v1074_v60, %v1187_v43  ;;  %vm245_vm4 = vcmp.lt.s32.totalorder %v1189_v45, 3  ;;  %vm244_vm5 = vcmp.lt.s32.totalorder %v1189_v45, 2  ;;  %v227_v44 = vshrl.u32 %v1069_v46, %v1187_v43 }
  0xbb   :  { %v230_v62 = vor.u32 %v229_v50, %v228_v47  ;;  %v233_v63 = vor.u32 %v232_v52, %v231_v49  ;;  %v236_v0 = vor.u32 %v235_v55, %v234_v53  ;;  %v239_v1 = vor.u32 %v238_v58, %v237_v56 }
  0xbc   :  { %v242_v2 = vor.u32 %v241_v61, %v240_v59 }
  0xbd   :  { %v251_v4 = vsel %vm243_vm2, %v230_v62, %v233_v63  ;;  %v255_v5 = vsel %vm243_vm2, %v233_v63, %v236_v0  ;;  %v252_v7 = vsel %vm246_vm3, %v239_v1, 920167782  ;;  %v248_v40 = vsel %vm246_vm3, %v236_v0, 2102212464 }
  0xbe   :  { %v256_v8 = vsel %vm246_vm3, %v242_v2, 1326507024  ;;  %v253_v9 = vsel %vm245_vm4, %v236_v0, %v252_v7  ;;  %v247_v52 = vsel %vm243_vm2, %v227_v44, %v230_v62  ;;  %v249_v53 = vsel %vm245_vm4, %v233_v63, %v248_v40  ;;  %v1233_v58 = vpop.f32.mrf.mxu3  ;;  %v970_v7 = vld [vmem:[#allocation5 + $0x38] sm:$0xff] }
  0xbf   :  { %v257_v10 = vsel %vm245_vm4, %v239_v1, %v256_v8  ;;  %v254_v11 = vsel %vm244_vm5, %v251_v4, %v253_v9  ;;  %v250_v43 = vsel %vm244_vm5, %v247_v52, %v249_v53  ;;  %630 = vmatpush.bf16.msrb.mxu0 %v970_v7  ;;  %987 = vmatpush.bf16.msra.mxu1 %v970_v7 }
  0xc0   :  { %v258_v12 = vsel %vm244_vm5, %v255_v5, %v257_v10  ;;  %v284_v17 = vand.u32 65535, %v254_v11  ;;  %v285_v18 = vshrl.u32 %v254_v11, 16  ;;  %v304_v0 = vmul.u32 %v1198_v3, %v250_v43  ;;  %v969_v10 = vld [vmem:[#allocation5 + $0x30] sm:$0xff] }
  0xc1   :  { %v262_v15 = vand.u32 65535, %v258_v12  ;;  %v263_v16 = vshrl.u32 %v258_v12, 16  ;;  %v968_v12 = vld [vmem:[#allocation5 + $0x28] sm:$0xff] }
  0xc2   :  { %v287_v21 = vmul.u32 %v285_v18, %v260_v13  ;;  %v288_v22 = vmul.u32 %v284_v17, %v261_v14  ;;  %v286_v27 = vmul.u32 %v284_v17, %v260_v13  ;;  %v289_v31 = vmul.u32 %v285_v18, %v261_v14 }
  0xc3   :  { %v265_v19 = vmul.u32 %v263_v16, %v260_v13  ;;  %v266_v20 = vmul.u32 %v262_v15, %v261_v14  ;;  %v264_v23 = vmul.u32 %v262_v15, %v260_v13  ;;  %v267_v26 = vmul.u32 %v263_v16, %v261_v14  ;;  %631 = vmatpush.bf16.msrb.mxu0 %v969_v10  ;;  %v967_v16 = vld [vmem:[#allocation5 + $0x20] sm:$0xff] }
  0xc4   :  { %v290_v28 = vshll.u32 %v287_v21, 16  ;;  %v292_v35 = vshll.u32 %v288_v22, 16  ;;  %v291_v50 = vshrl.u32 %v287_v21, 16  ;;  %v293_v56 = vshrl.u32 %v288_v22, 16  ;;  %988 = vmatpush.bf16.msra.mxu1 %v969_v10 }
  0xc5   :  { %v268_v24 = vshll.u32 %v265_v19, 16  ;;  %v270_v29 = vshll.u32 %v266_v20, 16  ;;  %v269_v47 = vshrl.u32 %v265_v19, 16  ;;  %v271_v54 = vshrl.u32 %v266_v20, 16 }
  0xc6   :  { %vm294_vm7 = vc.u32 %v286_v27, %v290_v28  ;;  %v296_v36 = vadd.s32 %v290_v28, %v286_v27  ;;  %v1238_v63 = vpop.f32.mrf.mxu3 }
  0xc7   :  { %vm272_vm6 = vc.u32 %v264_v23, %v268_v24  ;;  %v274_v30 = vadd.s32 %v268_v24, %v264_v23  ;;  %v295_v39 = vsel %vm294_vm7, 1, %v1075_v32  ;;  %632 = vmatpush.bf16.msrb.mxu0 %v968_v12  ;;  %v966_v23 = vld [vmem:[#allocation5 + $0x18] sm:$0xff]  ;;  %vm829_vm7 = vcmask 23552  }
  0xc8   :  { %v273_v33 = vsel %vm272_vm6, 1, %v1075_v32  ;;  %v297_v42 = vadd.s32 %v295_v39, %v289_v31  ;;  %vm298_vm9 = vc.u32 %v296_v36, %v292_v35  ;;  %v300_v60 = vadd.s32 %v296_v36, %v292_v35  ;;  %989 = vmatpush.bf16.msra.mxu1 %v968_v12  ;;  %v963_v39 = vld [vmem:[#allocation5] sm:$0xff] }
  0xc9   :  { %v275_v37 = vadd.s32 %v273_v33, %v267_v26  ;;  %vm276_vm8 = vc.u32 %v274_v30, %v270_v29  ;;  %v299_v49 = vsel %vm298_vm9, 1, %v1075_v32  ;;  %v965_v29 = vld [vmem:[#allocation5 + $0x10] sm:$0xff]  ;;  %v964_v33 = vld [vmem:[#allocation5 + $0x8] sm:$0xff]  ;;  %vm541_vm6 = vcmask 261120  }
  0xca   :  { %v277_v41 = vsel %vm276_vm8, 1, %v1075_v32  ;;  %v301_v51 = vadd.s32 %v299_v49, %v297_v42 }
  0xcb   :  { %v279_v48 = vadd.s32 %v277_v41, %v275_v37  ;;  %633 = vmatpush.bf16.msrb.mxu0 %v967_v16 }
  0xcc   :  { %v302_v57 = vadd.s32 %v301_v51, %v291_v50  ;;  %990 = vmatpush.bf16.msra.mxu1 %v967_v16 }
  0xcd   :  { %v280_v55 = vadd.s32 %v279_v48, %v269_v47 }
  0xce   :  { %v303_v46 = vadd.s32 %v302_v57, %v293_v56  ;;  %v1240_v45 = vpop.f32.mrf.mxu3 }
  0xcf   :  { %v281_v59 = vadd.s32 %v280_v55, %v271_v54  ;;  %634 = vmatpush.bf16.msrb.mxu0 %v966_v23 }
  0xd0   :  { %v307_v61 = vadd.s32 1, %v303_v46  ;;  %991 = vmatpush.bf16.msra.mxu1 %v966_v23 }
  0xd1   :  { %vm306_vm10 = vc.u32 %v281_v59, %v300_v60  ;;  %v305_v17 = vadd.s32 %v300_v60, %v281_v59 }
  0xd2   :  { %v308_v62 = vsel %vm306_vm10, %v307_v61, %v303_v46 }
  0xd3   :  { %v309_v1 = vadd.s32 %v308_v62, %v304_v0  ;;  %635 = vmatpush.bf16.msrb.mxu0 %v965_v29 }
  0xd4   :  { %992 = vmatpush.bf16.msra.mxu1 %v965_v29 }
  0xd5   :  { %v310_v2 = vadd.s32 536870912, %v309_v1 }
  0xd6   :  { %v1242_v15 = vpop.f32.mrf.mxu3 }
  0xd7   :  { %v311_v4 = vshrl.u32 %v310_v2, 30  ;;  %636 = vmatpush.bf16.msrb.mxu0 %v964_v33  ;;  %v526_v2 = vmul.f32 %v1205_v6, %v1205_v6 }
  0xd8   :  { %993 = vmatpush.bf16.msra.mxu1 %v964_v33 }
  0xd9   :  { %v312_v5 = vshll.u32 %v311_v4, 30  ;;  %v335_v37 = vsub.s32 4, %v311_v4 }
  0xdb   :  { %v313_v8 = vsub.s32 %v309_v1, %v312_v5  ;;  %637 = vmatpush.bf16.msrb.mxu0 %v963_v39  ;;  %v336_v44 = vsel %vm213_vm13, %v335_v37, %v311_v4  ;;  %v185_v1 = vpop.f32.mrf.mxu0  ;;  %v978_v37 = vld [vmem:[%s1359_s7 + $0x38] sm:$0xff] }
  0xdc   :  { %994 = vmatpush.bf16.msra.mxu1 %v963_v39  ;;  %v338_v51 = vsel %vm212_vm14, 0, %v336_v44  ;;  %780 = vmatpush.bf16.msra.mxu2 %v978_v37  ;;  %v977_v39 = vld [vmem:[%s1359_s7 + $0x30] sm:$0xff]  ;;  %v1009_v37 = vld [vmem:[%s1360_s8] ss:$0 sm:$0xff] }
  0xdd   :  { %vm314_vm11 = vcmp.lt.s32.totalorder %v313_v8, 0  ;;  %v315_v9 = vsub.s32 0, %v313_v8  ;;  %v355_v38 = vadd.s32 3, %v338_v51  ;;  %v510_v59 = vand.u32 3, %v338_v51  ;;  %v973_v51 = vld [vmem:[%s1359_s7 + $0x10] sm:$0xff] }
  0xde   :  { %v1244_v28 = vpop.f32.mrf.mxu3 }
  0xdf   :  { %v316_v11 = vsel %vm314_vm11, %v315_v9, %v313_v8  ;;  %v356_v46 = vand.u32 3, %v355_v38  ;;  %vm511_vm0 = vcmp.lt.s32.totalorder %v510_v59, 2  ;;  %vm512_vm1 = vcmp.eq.s32.totalorder %v510_v59, 0 }
  0xe0   :  { %v317_v3 = vclz %v316_v11  ;;  %vm515_vm2 = vcmp.eq.s32.totalorder %v510_v59, 2  ;;  %v527_v11 = vmul.f32 %v1223_v25, %v1223_v25  ;;  %781 = vmatpush.bf16.msra.mxu2 %v977_v39 }
  0xe1   :  { %vm357_vm3 = vcmp.lt.s32.totalorder %v356_v46, 2  ;;  %vm358_vm4 = vcmp.eq.s32.totalorder %v356_v46, 0  ;;  %vm361_vm5 = vcmp.eq.s32.totalorder %v356_v46, 2 }
  0xe2   :  { %v886_v13 = vadd.s32 4294967294, %v317_v3  ;;  %v528_v3 = vmul.f32 %v1233_v58, %v1233_v58 }
  0xe4   :  { %vm887_vm12 = vcmp.lt.s32.totalorder %v886_v13, 0 }
  0xe5   :  { %v320_v14 = vsel %vm887_vm12, 0, %v886_v13 }
  0xe6   :  { %v321_v18 = vsub.s32 32, %v320_v14  ;;  %v325_v19 = vsub.s32 4294967266, %v320_v14  ;;  %v322_v20 = vshll.u32 %v313_v8, %v320_v14  ;;  %v205_v41 = vpop.f32.mrf.mxu3  ;;  %v525_v14 = vmul.f32 %v185_v1, %v185_v1 }
  0xe8   :  { %v323_v21 = vshrl.u32 %v305_v17, %v321_v18  ;;  %v326_v22 = vadd.s32 127, %v325_v19 }
  0xea   :  { %v324_v24 = vor.u32 %v323_v21, %v322_v20  ;;  %v327_v26 = vshll.u32 %v326_v22, 23 }
  0xec   :  { %v328_v27 = vor.u32 4788187, %v327_v26  ;;  %v331_v31 = vcvt.s32.f32 %v324_v24 }
  0xee   :  { %v329_v30 = vand.u32 2147483647, %v328_v27 }
  0xf0   :  { %v332_v32 = vmul.f32 %v331_v31, %v329_v30 }
  0xf2   :  { %v333_v35 = vxor.u32 2147483648, %v332_v32 }
  0xf4   :  { %v334_v36 = vsel %vm213_vm13, %v333_v35, %v332_v32 }
  0xf5   :  { %v337_v40 = vsel %vm212_vm14, %v1181_v34, %v334_v36 }
  0xf6   :  { %v339_v42 = vmul.f32 %v337_v40, %v337_v40 }
  0xf8   :  { %v340_v47 = vmul.f32 -0.001358992, %v339_v42  ;;  %v347_v48 = vmul.f32 -0.00019511016, %v339_v42 }
  0xfa   :  { %v341_v49 = vadd.f32 0.041655596, %v340_v47  ;;  %v348_v50 = vadd.f32 0.008332121, %v347_v48  ;;  %v976_v48 = vld [vmem:[%s1359_s7 + $0x28] sm:$0xff] }
  0xfb   :  { %782 = vmatpush.bf16.msra.mxu2 %v976_v48 }
  0xfc   :  { %v342_v52 = vmul.f32 %v341_v49, %v339_v42  ;;  %v349_v53 = vmul.f32 %v348_v50, %v339_v42  ;;  %v975_v49 = vld [vmem:[%s1359_s7 + $0x20] sm:$0xff]  ;;  %v974_v50 = vld [vmem:[%s1359_s7 + $0x18] sm:$0xff] }
  0xfe   :  { %v343_v54 = vadd.f32 -0.4999988, %v342_v52  ;;  %v350_v55 = vadd.f32 -0.16666654, %v349_v53  ;;  %v972_v52 = vld [vmem:[%s1359_s7 + $0x8] sm:$0xff]  ;;  %v971_v53 = vld [vmem:[%s1359_s7] sm:$0xff] }
  0xff   :  { %783 = vmatpush.bf16.msra.mxu2 %v975_v49 }
 0x100   :  { %v344_v56 = vmul.f32 %v343_v54, %v339_v42  ;;  %v351_v57 = vmul.f32 %v350_v55, %v339_v42  ;;  %v1008_v54 = vld [vmem:[%s1358_s6] ss:$0 sm:$0xff] }
 0x102   :  { %v345_v60 = vadd.f32 1.0, %v344_v56  ;;  %v352_v43 = vadd.f32 1.0, %v351_v57 }
 0x103   :  { %784 = vmatpush.bf16.msra.mxu2 %v974_v50 }
 0x104   :  { %v353_v61 = vmul.f32 %v352_v43, %v337_v40  ;;  %v362_v0 = vxor.u32 2147483648, %v345_v60 }
 0x106   :  { %v359_v62 = vxor.u32 2147483648, %v353_v61  ;;  %v517_v5 = vsel %vm515_vm2, %v362_v0, %v353_v61  ;;  %v363_v8 = vsel %vm361_vm5, %v362_v0, %v353_v61 }
 0x107   :  { %785 = vmatpush.bf16.msra.mxu2 %v973_v51 }
 0x108   :  { %v514_v4 = vsel %vm512_vm1, %v345_v60, %v359_v62  ;;  %v360_v7 = vsel %vm358_vm4, %v345_v60, %v359_v62 }
 0x109   :  { %v518_v9 = vsel %vm511_vm0, %v514_v4, %v517_v5  ;;  %v364_v10 = vsel %vm357_vm3, %v360_v7, %v363_v8 }
 0x10a   :  { %v519_v12 = vsel %vm354_vm15, nan, %v518_v9  ;;  %v365_v13 = vsel %vm354_vm15, nan, %v364_v10 }
 0x10b   :  { %v520_v16 = vsub.f32 0.0, %v365_v13  ;;  %v521_v17 = vmul.f32 %v519_v12, %v185_v1  ;;  %542 = vst.msk [vmem:[#allocation2] sm:$0xff] %vm541_vm6, %v365_v13  ;;  %v522_v18 = vmul.f32 %v519_v12, %v1205_v6  ;;  %v523_v19 = vmul.f32 %v519_v12, %v1223_v25  ;;  %786 = vmatpush.bf16.msra.mxu2 %v972_v52 }
 0x10c   :  { %v524_v20 = vmul.f32 %v519_v12, %v1233_v58  ;;  %v533_v21 = vmul.f32 %v519_v12, %v1238_v63  ;;  %v534_v22 = vmul.f32 %v519_v12, %v1240_v45  ;;  %v535_v23 = vmul.f32 %v519_v12, %v1242_v15 }
 0x10d   :  { %v529_v24 = vmul.f32 %v525_v14, %v520_v16  ;;  %543 = vst.msk [vmem:[#allocation2 + $0x8] sm:$0xff] %vm541_vm6, %v521_v17  ;;  %v530_v34 = vmul.f32 %v526_v2, %v520_v16  ;;  %v531_v26 = vmul.f32 %v527_v11, %v520_v16  ;;  %v532_v27 = vmul.f32 %v528_v3, %v520_v16 }
 0x10e   :  { %544 = vst.msk [vmem:[#allocation2 + $0x10] sm:$0xff] %vm541_vm6, %v522_v18  ;;  %v536_v6 = vmul.f32 %v519_v12, %v1244_v28 }
 0x10f   :  { %545 = vst.msk [vmem:[#allocation2 + $0x18] sm:$0xff] %vm541_vm6, %v523_v19  ;;  %v537_v25 = vadd.f32 %v533_v21, %v529_v24  ;;  %v538_v58 = vadd.f32 %v534_v22, %v530_v34  ;;  %v539_v29 = vadd.f32 %v535_v23, %v531_v26  ;;  %787 = vmatpush.bf16.msra.mxu2 %v971_v53 }
 0x110   :  { %546 = vst.msk [vmem:[#allocation2 + $0x20] sm:$0xff] %vm541_vm6, %v524_v20  ;;  %v540_v63 = vadd.f32 %v536_v6, %v532_v27 }
 0x111   :  { %547 = vst.msk [vmem:[#allocation2 + $0x28] sm:$0xff] %vm541_vm6, %v537_v25 }
 0x112   :  { %548 = vst.msk [vmem:[#allocation2 + $0x30] sm:$0xff] %vm541_vm6, %v538_v58  ;;  %v568_v45 = vld [vmem:[#allocation2] sm:$0xff] }
 0x113   :  { %549 = vst.msk [vmem:[#allocation2 + $0x38] sm:$0xff] %vm541_vm6, %v539_v29 }
 0x114   :  { %550 = vst.msk [vmem:[#allocation2 + $0x40] sm:$0xff] %vm541_vm6, %v540_v63  ;;  %v569_v15 = vld [vmem:[#allocation2 + $0x8] sm:$0xff] }
 0x115   :  { %v577_v30 = vpack.c.bf16 %v569_v15, %v568_v45  ;;  %v570_v28 = vld [vmem:[#allocation2 + $0x10] sm:$0xff] }
 0x116   :  { %v571_v31 = vld [vmem:[#allocation2 + $0x18] sm:$0xff] }
 0x117   :  { %638 = vmatmul.bf16.vlgmr.msrb.gmra.mxu0 %v577_v30  ;;  %v578_v32 = vpack.c.bf16 %v571_v31, %v570_v28  ;;  %v572_v35 = vld [vmem:[#allocation2 + $0x20] sm:$0xff] }
 0x118   :  { %v573_v33 = vld [vmem:[#allocation2 + $0x28] sm:$0xff] }
 0x119   :  { %643 = vmatmul.bf16.vlgmr.msra.gmra.mxu1 %v578_v32  ;;  %v579_v36 = vpack.c.bf16 %v573_v33, %v572_v35  ;;  %v574_v40 = vld [vmem:[#allocation2 + $0x30] sm:$0xff] }
 0x11a   :  { %v575_v41 = vld [vmem:[#allocation2 + $0x38] sm:$0xff] }
 0x11b   :  { %v580_v42 = vpack.c.bf16 %v575_v41, %v574_v40  ;;  %v576_v44 = vld [vmem:[#allocation2 + $0x40] sm:$0xff] }
 0x11c   :  { %v581_v47 = vpack.c.bf16 %v576_v44, %v576_v44 }
 0x129   :  { %648 = vmatmul.bf16.gmra.mxu1 %v579_v36 }
 0x139   :  { %653 = vmatmul.bf16.gmra.mxu1 %v580_v42 }
 0x149   :  { %658 = vmatmul.bf16.gmra.mxu1 %v581_v47 }
 0x194   :  { %v639_v55 = vpop.f32.mrf.mxu0 }
 0x195   :  { %v666_v38 = vadd.f32 %v1008_v54, %v639_v55 }
 0x196   :  { %v644_v56 = vpop.f32.mrf.mxu1 }
 0x197   :  { %1010 = vtanh.f32 %v666_v38  ;;  %v677_v14 = vmul.f32 %v644_v56, %v644_v56 }
 0x19c   :  { %v641_v46 = vpop.f32.mrf.mxu0 }
 0x19d   :  { %v1011_v57 = vpop.eup %1010  ;;  %v676_v9 = vmul.f32 %v641_v46, %v641_v46 }
 0x19e   :  { %v668_v59 = vmul.f32 %v1011_v57, %v1011_v57  ;;  %692 = vst.msk [vmem:[#allocation2] sm:$0xff] %vm541_vm6, %v1011_v57  ;;  %v646_v60 = vpop.f32.mrf.mxu1  ;;  %v670_v4 = vmul.f32 -2.0, %v1011_v57 }
 0x19f   :  { %v678_v22 = vmul.f32 %v646_v60, %v646_v60 }
 0x1a0   :  { %v669_v43 = vsub.f32 1.0, %v668_v59 }
 0x1a2   :  { %v673_v61 = vmul.f32 %v669_v43, %v644_v56  ;;  %v672_v0 = vmul.f32 %v669_v43, %v641_v46  ;;  %v674_v62 = vmul.f32 %v669_v43, %v646_v60  ;;  %v671_v5 = vmul.f32 %v670_v4, %v669_v43 }
 0x1a4   :  { %694 = vst.msk [vmem:[#allocation2 + $0x10] sm:$0xff] %vm541_vm6, %v673_v61  ;;  %v680_v3 = vmul.f32 %v676_v9, %v671_v5  ;;  %v681_v17 = vmul.f32 %v677_v14, %v671_v5  ;;  %v682_v34 = vmul.f32 %v678_v22, %v671_v5 }
 0x1a5   :  { %693 = vst.msk [vmem:[#allocation2 + $0x8] sm:$0xff] %vm541_vm6, %v672_v0  ;;  %v718_v7 = vld [vmem:[#allocation2] sm:$0xff] }
 0x1a6   :  { %695 = vst.msk [vmem:[#allocation2 + $0x18] sm:$0xff] %vm541_vm6, %v674_v62  ;;  %v649_v1 = vpop.f32.mrf.mxu1 }
 0x1a7   :  { %v675_v2 = vmul.f32 %v669_v43, %v649_v1  ;;  %v679_v6 = vmul.f32 %v649_v1, %v649_v1 }
 0x1a9   :  { %696 = vst.msk [vmem:[#allocation2 + $0x20] sm:$0xff] %vm541_vm6, %v675_v2  ;;  %v683_v58 = vmul.f32 %v679_v6, %v671_v5 }
 0x1ab   :  { %v720_v20 = vld [vmem:[#allocation2 + $0x10] sm:$0xff] }
 0x1ac   :  { %v719_v8 = vld [vmem:[#allocation2 + $0x8] sm:$0xff] }
 0x1ad   :  { %v727_v10 = vpack.c.bf16 %v719_v8, %v718_v7  ;;  %v721_v21 = vld [vmem:[#allocation2 + $0x18] sm:$0xff] }
 0x1ae   :  { %v651_v11 = vpop.f32.mrf.mxu1  ;;  %v728_v23 = vpack.c.bf16 %v721_v21, %v720_v20 }
 0x1af   :  { %v684_v12 = vmul.f32 %v669_v43, %v651_v11  ;;  %788 = vmatmul.bf16.vlgmr.msra.gmra.mxu2 %v727_v10 }
 0x1b0   :  { %v722_v15 = vld [vmem:[#allocation2 + $0x20] sm:$0xff] }
 0x1b1   :  { %v688_v13 = vadd.f32 %v684_v12, %v680_v3 }
 0x1b3   :  { %697 = vst.msk [vmem:[#allocation2 + $0x28] sm:$0xff] %vm541_vm6, %v688_v13 }
 0x1b6   :  { %v654_v16 = vpop.f32.mrf.mxu1 }
 0x1b7   :  { %v685_v18 = vmul.f32 %v669_v43, %v654_v16 }
 0x1b9   :  { %v689_v19 = vadd.f32 %v685_v18, %v681_v17 }
 0x1ba   :  { %v723_v45 = vld [vmem:[#allocation2 + $0x28] sm:$0xff] }
 0x1bb   :  { %698 = vst.msk [vmem:[#allocation2 + $0x30] sm:$0xff] %vm541_vm6, %v689_v19  ;;  %v729_v30 = vpack.c.bf16 %v723_v45, %v722_v15 }
 0x1be   :  { %v656_v24 = vpop.f32.mrf.mxu1 }
 0x1bf   :  { %v686_v26 = vmul.f32 %v669_v43, %v656_v24  ;;  %793 = vmatmul.bf16.gmra.mxu2 %v728_v23 }
 0x1c1   :  { %v690_v27 = vadd.f32 %v686_v26, %v682_v34 }
 0x1c2   :  { %v724_v32 = vld [vmem:[#allocation2 + $0x30] sm:$0xff] }
 0x1c3   :  { %699 = vst.msk [vmem:[#allocation2 + $0x38] sm:$0xff] %vm541_vm6, %v690_v27 }
 0x1c6   :  { %v659_v25 = vpop.f32.mrf.mxu1 }
 0x1c7   :  { %v687_v29 = vmul.f32 %v669_v43, %v659_v25 }
 0x1c9   :  { %v691_v63 = vadd.f32 %v687_v29, %v683_v58 }
 0x1ca   :  { %v725_v31 = vld [vmem:[#allocation2 + $0x38] sm:$0xff] }
 0x1cb   :  { %700 = vst.msk [vmem:[#allocation2 + $0x40] sm:$0xff] %vm541_vm6, %v691_v63  ;;  %v730_v33 = vpack.c.bf16 %v725_v31, %v724_v32 }
 0x1ce   :  { %v661_v28 = vpop.f32.mrf.mxu1 }
 0x1cf   :  { %798 = vmatmul.bf16.gmra.mxu2 %v729_v30 }
 0x1d2   :  { %v726_v35 = vld [vmem:[#allocation2 + $0x40] sm:$0xff] }
 0x1d3   :  { %v731_v36 = vpack.c.bf16 %v726_v35, %v726_v35 }
 0x1df   :  { %803 = vmatmul.bf16.gmra.mxu2 %v730_v33 }
 0x1ef   :  { %808 = vmatmul.bf16.gmra.mxu2 %v731_v36 }
 0x232   :  { %v789_v39 = vpop.f32.mrf.mxu2 }
 0x233   :  { %v816_v40 = vadd.f32 %v1009_v37, %v789_v39 }
 0x235   :  { %830 = vst.msk [vmem:[%s1361_s9] sm:$0xff] %vm829_vm7, %v816_v40 }
 0x23a   :  { %v791_v41 = vpop.f32.mrf.mxu2 }
 0x23b   :  { %831 = vst.msk [vmem:[%s1362_s10] sm:$0xff] %vm829_vm7, %v791_v41  ;;  %v817_v48 = vmul.f32 %v791_v41, %v791_v41 }
 0x23d   :  { %v821_v49 = vmul.f32 0.0, %v817_v48 }
 0x242   :  { %v794_v42 = vpop.f32.mrf.mxu2 }
 0x243   :  { %832 = vst.msk [vmem:[%s1362_s10 + $0x8] sm:$0xff] %vm829_vm7, %v794_v42  ;;  %v818_v52 = vmul.f32 %v794_v42, %v794_v42 }
 0x245   :  { %v822_v53 = vmul.f32 0.0, %v818_v52 }
 0x24a   :  { %v796_v44 = vpop.f32.mrf.mxu2 }
 0x24b   :  { %833 = vst.msk [vmem:[%s1362_s10 + $0x10] sm:$0xff] %vm829_vm7, %v796_v44  ;;  %v819_v38 = vmul.f32 %v796_v44, %v796_v44 }
 0x24d   :  { %v823_v56 = vmul.f32 0.0, %v819_v38 }
 0x252   :  { %v799_v47 = vpop.f32.mrf.mxu2 }
 0x253   :  { %834 = vst.msk [vmem:[%s1362_s10 + $0x18] sm:$0xff] %vm829_vm7, %v799_v47  ;;  %v820_v60 = vmul.f32 %v799_v47, %v799_v47 }
 0x255   :  { %v824_v43 = vmul.f32 0.0, %v820_v60 }
 0x25a   :  { %v801_v50 = vpop.f32.mrf.mxu2 }
 0x25b   :  { %v825_v51 = vadd.f32 %v821_v49, %v801_v50 }
 0x25d   :  { %835 = vst.msk [vmem:[%s1363_s11] sm:$0xff] %vm829_vm7, %v825_v51 }
 0x262   :  { %v804_v54 = vpop.f32.mrf.mxu2 }
 0x263   :  { %v826_v55 = vadd.f32 %v822_v53, %v804_v54 }
 0x265   :  { %836 = vst.msk [vmem:[%s1363_s11 + $0x8] sm:$0xff] %vm829_vm7, %v826_v55 }
 0x26a   :  { %v806_v57 = vpop.f32.mrf.mxu2 }
 0x26b   :  { %v827_v59 = vadd.f32 %v823_v56, %v806_v57 }
 0x26d   :  { %837 = vst.msk [vmem:[%s1363_s11 + $0x10] sm:$0xff] %vm829_vm7, %v827_v59 }
 0x272   :  { %v809_v46 = vpop.f32.mrf.mxu2 }
 0x273   :  { %v828_v61 = vadd.f32 %v824_v43, %v809_v46 }
 0x275   :  { %838 = vst.msk [vmem:[%s1363_s11 + $0x18] sm:$0xff] %vm829_vm7, %v828_v61 }
 0x27a   :  { %v811_v0 = vpop.f32.mrf.mxu2 }
 0x27b   :  { %851 = vsyncpa [#allocation4], 1 }
 0x27c   :  { %852 = vsyncpa [#allocation6], 1 }

</bundles_post_ra>
